<compile_context>
chip_gen: v7x
topology: tpu7x:2x2x1
jax: 0.10.0
libtpu: 0.0.40
codegen_flags: <defaults>
</compile_context>

<pallas_src>
import math
from functools import partial

import jax
import jax.numpy as jnp
from jax import lax
from jax.experimental import pallas as pl
from jax.experimental.pallas import tpu as pltpu


# ------------------------------ tiled linear -------------------------------- #

def _pick_tile(dim, desired, align):
    """Largest tile <= desired that divides dim and is a multiple of align,
    falling back to the full dim (always legal for a BlockSpec)."""
    if dim <= desired:
        return dim
    t = (desired // align) * align
    while t >= align:
        if dim % t == 0:
            return t
        t -= align
    return dim


def _linear_kernel(x_ref, w_ref, b_ref, o_ref, acc_ref):
    """One (i, j, k) tile of o = x @ w + b with an f32 accumulator over k."""
    k = pl.program_id(2)

    @pl.when(k == 0)
    def _():
        acc_ref[...] = jnp.zeros_like(acc_ref)

    acc_ref[...] += jnp.dot(x_ref[...], w_ref[...],
                            preferred_element_type=jnp.float32)

    @pl.when(k == pl.num_programs(2) - 1)
    def _():
        o_ref[...] = (acc_ref[...] + b_ref[...].astype(jnp.float32)).astype(o_ref.dtype)


def linear(x2d, w, b, *, tm=256, tn=256, tk=512):
    """nn.Linear equivalent: x2d [M, Din], w [Din, Dout] (stored [in, out]), b [Dout]."""
    M, Din = x2d.shape
    Dout = w.shape[1]

    tm = _pick_tile(M, tm, 8)        # second-to-last dims -> multiple of 8 (or full)
    tn = _pick_tile(Dout, tn, 128)   # lane dims -> multiple of 128 (or full)
    tk = _pick_tile(Din, tk, 128)

    grid = (M // tm, Dout // tn, Din // tk)

    # VMEM budget: double-buffered inputs + output + accumulator.  Only raise the
    # scoped limit when the tiles actually need it (leave headroom for the compiler).
    itemsize = jnp.dtype(x2d.dtype).itemsize
    est = (2 * (tm * tk + tk * tn + tn) * itemsize
           + 2 * tm * tn * itemsize
           + tm * tn * 4)
    vmem_limit = int(est * 1.3) if est * 1.3 > (24 << 20) else None

    return pl.pallas_call(
        _linear_kernel,
        out_shape=jax.ShapeDtypeStruct((M, Dout), x2d.dtype),
        grid=grid,
        in_specs=[
            pl.BlockSpec((tm, tk), lambda i, j, k: (i, k)),
            pl.BlockSpec((tk, tn), lambda i, j, k: (k, j)),
            pl.BlockSpec((1, tn), lambda i, j, k: (0, j)),
        ],
        out_specs=pl.BlockSpec((tm, tn), lambda i, j, k: (i, j)),
        scratch_shapes=[pltpu.VMEM((tm, tn), jnp.float32)],
        compiler_params=pltpu.CompilerParams(
            dimension_semantics=("parallel", "parallel", "arbitrary"),
            vmem_limit_bytes=vmem_limit,
        ),
    )(x2d, w, b.reshape(1, Dout))


# ----------------------------- attention kernel ----------------------------- #

def _mha_attn_kernel(*refs, scale, heads, d_k, masked):
    """Scaled dot-product attention for one (batch, head-group) tile.

    q/k/v refs: [S, heads*d_k]; mask ref (optional): [S, S] int8 (0 => masked);
    out ref: [S, heads*d_k] (lane-dense packed-heads store).
    """
    if masked:
        q_ref, k_ref, v_ref, m_ref, o_ref = refs
    else:
        q_ref, k_ref, v_ref, o_ref = refs

    q = q_ref[...]          # keep MXU operands in the input dtype (bf16 stays bf16)
    k = k_ref[...]
    v = v_ref[...]

    if masked:
        keep = m_ref[...] != 0          # [S, S], shared by every head in the group

    outs = []
    for hh in range(heads):             # static, small unrolled loop over packed heads
        lo = hh * d_k
        qh = q[:, lo:lo + d_k]
        kh = k[:, lo:lo + d_k]
        vh = v[:, lo:lo + d_k]

        # scores = qh @ kh^T without an explicit transpose: contract the last dims.
        s = lax.dot_general(qh, kh, (((1,), (1,)), ((), ())),
                            preferred_element_type=jnp.float32) * scale
        if masked:
            s = jnp.where(keep, s, jnp.float32(-1e9))

        # softmax in f32 (v5e has no bf16 VPU/EUP); denom reciprocal on the EUP slot.
        m = jnp.max(s, axis=-1, keepdims=True)
        p = jnp.exp(s - m)
        p = p * pl.reciprocal(jnp.sum(p, axis=-1, keepdims=True), approx=True)

        outs.append(jnp.dot(p.astype(vh.dtype), vh,
                            preferred_element_type=jnp.float32))

    # One wide, lane-dense store for all heads in this group.
    o_ref[...] = jnp.concatenate(outs, axis=-1).astype(o_ref.dtype)


def _pick_heads_per_group(h, d_k, seq_len, scores_budget_bytes=8 << 20):
    """Pack heads per grid step: reach a lane-dense (>=128) output block if possible
    while keeping the per-step f32 scores within a VMEM budget."""
    best = 1
    for g in range(1, h + 1):
        if h % g:
            continue
        if g * seq_len * seq_len * 4 > scores_budget_bytes:
            break
        best = g
        if g * d_k >= 128:
            break
    return best


def mha_attention(q_act, k_act, v_act, mask, h, d_k, *, q_col=0, k_col=0, v_col=0):
    """Multi-head scaled dot-product attention.

    q_act/k_act/v_act: [B, S, >=h*d_k] activation buffers; head columns for each operand
    start at q_col/k_col/v_col (lets a fused [B, S, 3D] QKV buffer be read directly).
    mask: [B, S, S] (1 = keep, 0 = mask) or None.  Returns [B, S, h*d_k].
    """
    B, S, _ = q_act.shape
    D = h * d_k
    scale = 1.0 / math.sqrt(d_k)

    gpg = _pick_heads_per_group(h, d_k, S)    # heads processed per grid step
    n_groups = h // gpg
    gw = gpg * d_k                            # block width along d_model

    assert q_col % gw == 0 and k_col % gw == 0 and v_col % gw == 0
    qb, kb, vb = q_col // gw, k_col // gw, v_col // gw

    def _spec(base):
        return pl.BlockSpec((pl.Squeezed(), S, gw),
                            lambda b, g, base=base: (b, 0, base + g))

    in_specs = [_spec(qb), _spec(kb), _spec(vb)]
    args = [q_act, k_act, v_act]
    if mask is not None:
        in_specs.append(pl.BlockSpec((pl.Squeezed(), S, S), lambda b, g: (b, 0, 0)))
        args.append(mask.astype(jnp.int8))    # 4x less mask DMA than int32

    kernel = partial(_mha_attn_kernel, scale=scale, heads=gpg, d_k=d_k,
                     masked=mask is not None)

    return pl.pallas_call(
        kernel,
        out_shape=jax.ShapeDtypeStruct((B, S, D), q_act.dtype),
        grid=(B, n_groups),
        in_specs=in_specs,
        out_specs=pl.BlockSpec((pl.Squeezed(), S, gw), lambda b, g: (b, 0, g)),
        compiler_params=pltpu.CompilerParams(
            dimension_semantics=("parallel", "parallel")),
    )(*args)


# ------------------------------ module wrapper ------------------------------- #

def init_mha_params(key, d_model):
    """4 x nn.Linear(d_model, d_model): weights stored [Din, Dout] + bias [Dout]."""
    params = []
    bound = 1.0 / math.sqrt(d_model)
    for _ in range(4):
        kw, kb, key = jax.random.split(key, 3)
        w = jax.random.uniform(kw, (d_model, d_model), jnp.float32, -bound, bound)
        b = jax.random.uniform(kb, (d_model,), jnp.float32, -bound, bound)
        params.append((w, b))
    return params


def multi_headed_attention(params, h, query, key, value, mask=None):
    """Forward of MultiHeadedAttention (eval mode).  query/key/value: [B, S, D].
    mask: [B, S, S] or [B, 1, S] or None (1 = keep, 0 = masked)."""
    B, S, D = query.shape
    d_k = D // h

    if mask is not None:
        mask = jnp.asarray(mask)
        if mask.ndim == 3 and mask.shape[1] == 1:        # padding mask -> broadcast
            mask = jnp.broadcast_to(mask, (B, S, S))

    if query is key and key is value:
        # Self-attention: one fused [D, 3D] projection GEMM; attention BlockSpecs pull
        # q/k/v head columns straight out of the fused buffer (no slicing copies).
        w_qkv = jnp.concatenate([params[0][0], params[1][0], params[2][0]], axis=1)
        b_qkv = jnp.concatenate([params[0][1], params[1][1], params[2][1]], axis=0)
        qkv = linear(query.reshape(B * S, D), w_qkv, b_qkv).reshape(B, S, 3 * D)
        x = mha_attention(qkv, qkv, qkv, mask, h, d_k,
                          q_col=0, k_col=D, v_col=2 * D)
    else:
        q3 = linear(query.reshape(B * S, D), *params[0]).reshape(B, S, D)
        k3 = linear(key.reshape(B * S, D), *params[1]).reshape(B, S, D)
        v3 = linear(value.reshape(B * S, D), *params[2]).reshape(B, S, D)
        x = mha_attention(q3, k3, v3, mask, h, d_k)

    # x is already in [B, S, h*d_k] "concat heads" layout -> final projection.
    out = linear(x.reshape(B * S, D), *params[3])
    return out.reshape(B, S, D)


# -------------------------------- reference ---------------------------------- #

def reference_mha(params, h, query, key, value, mask=None):
    B, S, D = query.shape
    d_k = D // h

    def proj(x, w, b):
        y = x.reshape(B * S, D) @ w + b
        return jnp.transpose(y.reshape(B, S, h, d_k), (0, 2, 1, 3))

    q = proj(query, *params[0])
    k = proj(key, *params[1])
    v = proj(value, *params[2])

    scores = jnp.einsum("bhqd,bhkd->bhqk", q, k) / math.sqrt(d_k)
    if mask is not None:
        scores = jnp.where(mask[:, None, :, :] == 0, -1e9, scores)
    p = jax.nn.softmax(scores, axis=-1)
    x = jnp.einsum("bhqk,bhkd->bhqd", p, v)
    x = jnp.transpose(x, (0, 2, 1, 3)).reshape(B * S, D)
    return (x @ params[3][0] + params[3][1]).reshape(B, S, D)


# ---------------------------------- main -------------------------------------- #

if __name__ == "__main__":
    B, S, D, H = 2, 8, 32, 4   # batch, seq, d_model, heads  (d_k = 8)

    root = jax.random.PRNGKey(0)
    k_q, k_k, k_v, k_p = jax.random.split(root, 4)

    query = jax.random.normal(k_q, (B, S, D), jnp.float32)
    key = jax.random.normal(k_k, (B, S, D), jnp.float32)
    value = jax.random.normal(k_v, (B, S, D), jnp.float32)
    params = init_mha_params(k_p, D)

    # causal mask, same for every batch (1 = attend, 0 = masked)
    mask = jnp.tril(jnp.ones((S, S), jnp.int32))[None].repeat(B, axis=0)

    # Cross-attention path (separate projections) with a causal mask.
    out = jax.block_until_ready(
        multi_headed_attention(params, H, query, key, value, mask))
    ref = reference_mha(params, H, query, key, value, mask)
    assert out.shape == (B, S, D)
    assert jnp.allclose(out, ref, atol=1e-2, rtol=1e-2), "mismatch (masked path)"

    # Self-attention path (fused QKV GEMM, no mask -> mask-free kernel specialization).
    out2 = jax.block_until_ready(
        multi_headed_attention(params, H, query, query, query, None))
    ref2 = reference_mha(params, H, query, query, query, None)
    assert jnp.allclose(out2, ref2, atol=1e-2, rtol=1e-2), "mismatch (fused path)"

    print("KERNEL_OK")
</pallas_src>

<mosaic_0001>
module attributes {stable_mosaic.version = 11 : i64} {
  func.func @_linear_kernel(%arg0: i32, %arg1: i32, %arg2: i32, %arg3: memref<16x32xf32, #tpu.memory_space<vmem>>, %arg4: memref<32x32xf32, #tpu.memory_space<vmem>>, %arg5: memref<1x32xf32, #tpu.memory_space<vmem>>, %arg6: memref<16x32xf32, #tpu.memory_space<vmem>>, %arg7: memref<16x32xf32, #tpu.memory_space<vmem>>) attributes {dimension_semantics = [#tpu.dimension_semantics<parallel>, #tpu.dimension_semantics<parallel>, #tpu.dimension_semantics<arbitrary>], iteration_bounds = array<i64: 1, 1, 1>, scalar_prefetch = 0 : i64, scratch_operands = 1 : i64, tpu.core_type = #tpu.core_type<tc>, window_params = [{transform_indices = @transform_0, window_bounds = array<i64: 16, 32>}, {transform_indices = @transform_1, window_bounds = array<i64: 32, 32>}, {transform_indices = @transform_2, window_bounds = array<i64: 1, 32>}, {transform_indices = @transform_3, window_bounds = array<i64: 16, 32>}]} {
    %c0_i32 = arith.constant 0 : i32
    %0 = arith.cmpi eq, %arg2, %c0_i32 : i32
    %1 = arith.extui %0 : i1 to i32
    %c0_i32_0 = arith.constant 0 : i32
    %2 = arith.cmpi ne, %1, %c0_i32_0 : i32
    scf.if %2 {
      %cst_10 = arith.constant 0.000000e+00 : f32
      %12 = vector.broadcast %cst_10 : f32 to vector<16x32xf32>
      %c0_11 = arith.constant 0 : index
      %c0_12 = arith.constant 0 : index
      %13 = vector.load %arg7[%c0_11, %c0_12] : memref<16x32xf32, #tpu.memory_space<vmem>>, vector<16x32xf32>
      tpu.vector_store %arg7[%c0_11, %c0_12], %12 {strides = array<i32>} : memref<16x32xf32, #tpu.memory_space<vmem>>, vector<16x32xf32>,
    } else {
    }
    %c0 = arith.constant 0 : index
    %c0_1 = arith.constant 0 : index
    %3 = vector.load %arg7[%c0, %c0_1] : memref<16x32xf32, #tpu.memory_space<vmem>>, vector<16x32xf32>
    %c0_2 = arith.constant 0 : index
    %c0_3 = arith.constant 0 : index
    %4 = vector.load %arg3[%c0_2, %c0_3] : memref<16x32xf32, #tpu.memory_space<vmem>>, vector<16x32xf32>
    %c0_4 = arith.constant 0 : index
    %c0_5 = arith.constant 0 : index
    %5 = vector.load %arg4[%c0_4, %c0_5] : memref<32x32xf32, #tpu.memory_space<vmem>>, vector<32x32xf32>
    %cst = arith.constant dense<0.000000e+00> : vector<16x32xf32>
    %6 = tpu.matmul %4, %5, %cst {dimension_numbers = #tpu.dot_dimension_numbers<[1], [0], [0], [1], [0, 0, 1, 1], [], []>} : vector<16x32xf32>, vector<32x32xf32>, vector<16x32xf32> -> vector<16x32xf32>
    %7 = arith.addf %3, %6 : vector<16x32xf32>
    %c0_6 = arith.constant 0 : index
    %c0_7 = arith.constant 0 : index
    %8 = vector.load %arg7[%c0_6, %c0_7] : memref<16x32xf32, #tpu.memory_space<vmem>>, vector<16x32xf32>
    tpu.vector_store %arg7[%c0_6, %c0_7], %7 {strides = array<i32>} : memref<16x32xf32, #tpu.memory_space<vmem>>, vector<16x32xf32>,
    %c0_i32_8 = arith.constant 0 : i32
    %9 = arith.cmpi eq, %arg2, %c0_i32_8 : i32
    %10 = arith.extui %9 : i1 to i32
    %c0_i32_9 = arith.constant 0 : i32
    %11 = arith.cmpi ne, %10, %c0_i32_9 : i32
    scf.if %11 {
      %c0_10 = arith.constant 0 : index
      %c0_11 = arith.constant 0 : index
      %12 = vector.load %arg7[%c0_10, %c0_11] : memref<16x32xf32, #tpu.memory_space<vmem>>, vector<16x32xf32>
      %c0_12 = arith.constant 0 : index
      %c0_13 = arith.constant 0 : index
      %13 = vector.load %arg5[%c0_12, %c0_13] : memref<1x32xf32, #tpu.memory_space<vmem>>, vector<1x32xf32>
      %14 = vector.broadcast %13 : vector<1x32xf32> to vector<16x32xf32>
      %15 = arith.addf %12, %14 : vector<16x32xf32>
      %c0_14 = arith.constant 0 : index
      %c0_15 = arith.constant 0 : index
      %16 = vector.load %arg6[%c0_14, %c0_15] : memref<16x32xf32, #tpu.memory_space<vmem>>, vector<16x32xf32>
      tpu.vector_store %arg6[%c0_14, %c0_15], %15 {strides = array<i32>} : memref<16x32xf32, #tpu.memory_space<vmem>>, vector<16x32xf32>,
    } else {
    }
    return
  }
  func.func @transform_0(%arg0: i32, %arg1: i32, %arg2: i32) -> (i32, i32) {
    %c0_i32 = arith.constant 0 : i32
    return %arg0, %arg2 : i32, i32
  }
  func.func @transform_1(%arg0: i32, %arg1: i32, %arg2: i32) -> (i32, i32) {
    %c0_i32 = arith.constant 0 : i32
    return %arg2, %arg1 : i32, i32
  }
  func.func @transform_2(%arg0: i32, %arg1: i32, %arg2: i32) -> (i32, i32) {
    %c0_i32 = arith.constant 0 : i32
    %c0_i32_0 = arith.constant 0 : i32
    return %c0_i32, %arg1 : i32, i32
  }
  func.func @transform_3(%arg0: i32, %arg1: i32, %arg2: i32) -> (i32, i32) {
    %c0_i32 = arith.constant 0 : i32
    return %arg0, %arg1 : i32, i32
  }
}

</mosaic_0001>

<bundles_post_ra>
// kernel: tpu_custom_call.1
= control target key start
LH: loop header
LB: loop body
LE: loop exit
PB: predicated region body
PF: predicated region fallthrough
CT: control target
= control target key end

     0   :  { %8 = vsyncpa [#allocation4], 0  ;;  %s366_s0 = inlined_call_operand.hbm [shape: f32[16,32], index: 0, kind: input, shape index: {}]   ;;  %s367_s1 = inlined_call_operand.hbm [shape: f32[32,32], index: 1, kind: input, shape index: {}]   ;;  %s368_s2 = inlined_call_operand.vmem [shape: f32[1,32], index: 2, kind: input, shape index: {}]   ;;  %s369_s3 = inlined_call_operand.hbm [shape: f32[16,32], index: 3, kind: output, shape index: {}]  }
   0x1   :  { %9 = vsyncpa [#allocation7], 0 }
   0x2   :  { %10 = vsyncpa [#allocation5], 0  ;;  %s284_s12 = smov [#allocation3]   ;;  %s212_s16 = scalar_lea.hbm %s366_s0, 256 }
   0x3   :  { %s16_s13 = sshll.u32 %s284_s12, 4  ;;  %p213_p0 = scmp.ne.s32.totalorder %s366_s0, %s212_s16  ;;  %s17_s13 = int_to_ptr.vmem [resolvable:$true] %s16_s13 }
   0x4   :  { %p216_p1 = scmp.lt.u32.totalorder %s212_s16, %s366_s0 }
   0x6   :  { %p218_p2 = pnand %p216_p1, %p213_p0 }
   0x8   :  { %221 = shalt.err (!%p218_p2)
}
   0x9   :  { %s222_s21 = scalar_lea.vmem %s17_s13, 256  ;;  %p227_p4 = scmp.lt.s32.totalorder %s17_s13, %s17_s13 }
   0xa   :  { %p223_p3 = scmp.ne.s32.totalorder %s17_s13, %s222_s21  ;;  %p228_p5 = scmp.lt.s32.totalorder %s222_s21, %s222_s21 }
   0xc   :  { %p229_p6 = por %p228_p5, %p227_p4 }
   0xe   :  { %p230_p7 = pnand %p229_p6, %p223_p3 }
  0x10   :  { %233 = shalt.err (!%p230_p7)
}
  0x11   :  { %s285_s22 = smov 128   ;;  %s286_s23 = smov 8  }
  0x12   :  { %22 = dma.hbm_to_vmem [thread:$0]  %s366_s0, 256, %s17_s13, [#allocation4], %s285_s22, %s285_s22, %s286_s23  }
  0x13   :  { %s287_s26 = smov [#allocation6]   ;;  %s234_s30 = scalar_lea.hbm %s367_s1, 512 }
  0x14   :  { %s28_s27 = sshll.u32 %s287_s26, 4  ;;  %p235_p8 = scmp.ne.s32.totalorder %s367_s1, %s234_s30  ;;  %s29_s27 = int_to_ptr.vmem [resolvable:$true] %s28_s27 }
  0x15   :  { %p238_p9 = scmp.lt.u32.totalorder %s234_s30, %s367_s1 }
  0x17   :  { %p240_p10 = pnand %p238_p9, %p235_p8 }
  0x19   :  { %243 = shalt.err (!%p240_p10)
}
  0x1a   :  { %s244_s8 = scalar_lea.vmem %s29_s27, 512  ;;  %p249_p12 = scmp.lt.s32.totalorder %s29_s27, %s29_s27 }
  0x1b   :  { %p245_p11 = scmp.ne.s32.totalorder %s29_s27, %s244_s8  ;;  %p250_p13 = scmp.lt.s32.totalorder %s244_s8, %s244_s8 }
  0x1d   :  { %p251_p0 = por %p250_p13, %p249_p12 }
  0x1f   :  { %p252_p1 = pnand %p251_p0, %p245_p11 }
  0x21   :  { %255 = shalt.err (!%p252_p1)
}
  0x22   :  { %34 = dma.hbm_to_vmem [thread:$0]  %s367_s1, 512, %s29_s27, [#allocation7], %s285_s22, %s285_s22, %s286_s23  }
  0x23   :  { %278 = dma.done.wait [#allocation4], 256  }
  0x24   :  { %279 = vsyncadd [#allocation4], 4294967040 }
  0x25   :  { %280 = dma.done.wait [#allocation7], 512  }
  0x26   :  { %281 = vsyncadd [#allocation7], 4294966784  ;;  %vm47_vm0 = vcmask 261120   ;;  %v288_v0 = vmov 0.0   ;;  %v54_v1 = vld [vmem:[#allocation6] sm:$0xff]  ;;  %v55_v2 = vld [vmem:[#allocation6 + $0x8] sm:$0xff] }
  0x27   :  { %49 = vst.msk [vmem:[#allocation2 + $0x8] sm:$0xff] %vm47_vm0, %v288_v0  ;;  %48 = vst.msk [vmem:[#allocation2] sm:$0xff] %vm47_vm0, %v288_v0  ;;  %v56_v3 = vld [vmem:[#allocation6 + $0x10] sm:$0xff]  ;;  %v198_v4 = vpack.c.bf16 %v55_v2, %v54_v1  ;;  %v57_v5 = vld [vmem:[#allocation6 + $0x18] sm:$0xff]  ;;  %s289_s11 = smov [#allocation8]  }
  0x28   :  { %v52_v6 = vld [vmem:[#allocation3] sm:$0xff]  ;;  %v202_v7 = vpack.c.bf16 %v57_v5, %v56_v3  ;;  %v53_v8 = vld [vmem:[#allocation3 + $0x8] sm:$0xff]  ;;  %v180_v15 = vld [vmem:[%s368_s2] ss:$0 sm:$0xff]  ;;  %s165_s12 = sshll.u32 %s289_s11, 4  ;;  %s166_s12 = int_to_ptr.vmem [resolvable:$true] %s165_s12 }
  0x29   :  { %195 = vmatprep.mubr.msk.f32.mxu0 %vm47_vm0, %v52_v6  ;;  %199 = vmatprep.subr.bf16.mxu0 %v198_v4  ;;  %s256_s13 = scalar_lea.vmem %s166_s12, 256  ;;  %p261_p3 = scmp.lt.s32.totalorder %s166_s12, %s166_s12 }
  0x2a   :  { %201 = vmatpush3.bf16.msra.mxu0 %v198_v4  ;;  %p257_p2 = scmp.ne.s32.totalorder %s166_s12, %s256_s13  ;;  %p262_p4 = scmp.lt.s32.totalorder %s256_s13, %s256_s13 }
  0x2b   :  { %203 = vmatprep.subr.bf16.mxu0 %v202_v7 }
  0x2c   :  { %p263_p5 = por %p262_p4, %p261_p3 }
  0x2e   :  { %205 = vmatpush3.bf16.msra.mxu0 %v202_v7  ;;  %v51_v9 = vld [vmem:[#allocation2 + $0x8] sm:$0xff]  ;;  %v50_v10 = vld [vmem:[#allocation2] sm:$0xff]  ;;  %p264_p6 = pnand %p263_p5, %p257_p2 }
  0x31   :  { %196 = vmatmul.mubr.msk.f32.vlgmr.msra.gmra.mrb[0].mxu0 %vm47_vm0, %v53_v8 }
 0x104   :  { %v197_v11 = vpop.f32.mrb[0].mxu0 }
 0x105   :  { %v141_v12 = vadd.f32 %v197_v11, %v51_v9  ;;  %v131_v13 = vpop.f32.mrb[1].mxu0 }
 0x106   :  { %v140_v14 = vadd.f32 %v131_v13, %v50_v10 }
 0x107   :  { %143 = vst.msk [vmem:[#allocation2 + $0x8] sm:$0xff] %vm47_vm0, %v141_v12 }
 0x108   :  { %142 = vst.msk [vmem:[#allocation2] sm:$0xff] %vm47_vm0, %v140_v14 }
 0x10e   :  { %v148_v16 = vld [vmem:[#allocation2 + $0x8] sm:$0xff] }
 0x10f   :  { %v147_v17 = vld [vmem:[#allocation2] sm:$0xff]  ;;  %v157_v18 = vadd.f32 %v180_v15, %v148_v16 }
 0x110   :  { %v156_v19 = vadd.f32 %v180_v15, %v147_v17 }
 0x111   :  { %159 = vst.msk [vmem:[#allocation8 + $0x8] sm:$0xff] %vm47_vm0, %v157_v18 }
 0x112   :  { %158 = vst.msk [vmem:[#allocation8] sm:$0xff] %vm47_vm0, %v156_v19 }
 0x113   :  { %267 = shalt.err (!%p264_p6)
}
 0x114   :  { %s268_s15 = scalar_lea.hbm %s369_s3, 256 }
 0x115   :  { %p269_p7 = scmp.ne.s32.totalorder %s369_s3, %s268_s15  ;;  %p272_p8 = scmp.lt.u32.totalorder %s268_s15, %s369_s3 }
 0x117   :  { %p274_p9 = pnand %p272_p8, %p269_p7 }
 0x119   :  { %277 = shalt.err (!%p274_p9)
}
 0x11a   :  { %171 = dma.vmem_to_hbm [thread:$0]  %s166_s12, 256, %s369_s3, [#allocation5], %s285_s22, %s285_s22, %s286_s23  }
 0x11b   :  { %282 = dma.done.wait [#allocation5], 256  }
 0x11c   :  { %283 = vsyncadd [#allocation5], 4294967040 }
 0x11d   :  { %175 = vsyncpa [#allocation4], 1 }
 0x11e   :  { %176 = vsyncpa [#allocation7], 1 }
 0x11f   :  { %177 = vsyncpa [#allocation5], 1 }

</bundles_post_ra>
